<compile_context>
chip_gen: v5e
topology: v5e:2x2
jax: 0.10.0
libtpu: 0.0.40
codegen_flags: <defaults>
</compile_context>

<pallas_src>
import jax
import jax.numpy as jnp
from jax.experimental import pallas as pl
from jax.experimental.pallas import tpu as pltpu

IN_RAW, H1, H2_RAW, OUT_RAW = 28 * 28, 256, 64, 10
H2_PAD = 128     # 64  padded to 128 (lane-dense)
OUT_PAD = 128    # 10  padded to 128 (lane-dense output store)


def mlp_kernel(x_ref, w1_ref, b1_ref, w2_ref, b2_ref, w3_ref, b3_ref, o_ref):
    # fp32 activations from HBM, cast to bf16 in-register (VPU, essentially free).
    x = x_ref[...].astype(jnp.bfloat16)
    # fc1 + ReLU: bf16 operands on the MXU, fp32 accumulation & epilogue.
    h1 = jnp.dot(x, w1_ref[...], preferred_element_type=jnp.float32)
    h1 = jnp.maximum(h1 + b1_ref[...], 0.0)
    # fc2 + ReLU (padded hidden columns are exactly zero: w2/b2 pad = 0).
    h2 = jnp.dot(h1.astype(jnp.bfloat16), w2_ref[...],
                 preferred_element_type=jnp.float32)
    h2 = jnp.maximum(h2 + b2_ref[...], 0.0)
    # fc3 logits (padded output columns are exactly zero: w3/b3 pad = 0).
    h3 = jnp.dot(h2.astype(jnp.bfloat16), w3_ref[...],
                 preferred_element_type=jnp.float32)
    o_ref[...] = (h3 + b3_ref[...]).astype(o_ref.dtype)


def _round_up(n, m):
    return ((n + m - 1) // m) * m


def _pad2(a, rows, cols):
    return jnp.pad(a, ((0, rows - a.shape[0]), (0, cols - a.shape[1])))


def prepare_params(w1, b1, w2, b2, w3, b3):
    """One-time parameter prep: pad to lane-dense shapes + cast weights to bf16.

    Weights are stored (in_features, out_features).  Do this ONCE (e.g. after
    loading a checkpoint), not per forward call.
    """
    w1p = w1.astype(jnp.bfloat16)                               # (784, 256)
    w2p = _pad2(w2, H1, H2_PAD).astype(jnp.bfloat16)            # (256, 128)
    w3p = _pad2(w3, H2_PAD, OUT_PAD).astype(jnp.bfloat16)       # (128, 128)
    b1p = b1.reshape(1, H1).astype(jnp.float32)                 # (1, 256)
    b2p = _pad2(b2.reshape(1, H2_RAW), 1, H2_PAD).astype(jnp.float32)
    b3p = _pad2(b3.reshape(1, OUT_RAW), 1, OUT_PAD).astype(jnp.float32)
    return (w1p, b1p, w2p, b2p, w3p, b3p)


def _choose_tb(B, tb_cap):
    if B < 256:
        # Tiny/demo batches: a single 16-row-aligned tile (packed bf16 sublanes).
        return max(16, _round_up(B, 16))
    # Real batches: multiple of 128 (256 where possible), capped at tb_cap,
    # and <= half the padded batch so the grid has >= 2 steps (v7x: 2 TCs).
    half = _round_up(B, 256) // 2
    return int(min(tb_cap, max(128, (half // 128) * 128)))


def net_forward(x, params, *, tb=1024):
    """Forward pass. x: (B, 784) fp32; params from prepare_params()."""
    w1p, b1p, w2p, b2p, w3p, b3p = params
    B = x.shape[0]
    TB = _choose_tb(B, tb)
    B_pad = _round_up(B, TB)

    xp = x if B_pad == B else jnp.pad(x, ((0, B_pad - B), (0, 0)))
    xp = xp.astype(jnp.float32)

    def resident(shape):
        # Weights/biases: same block every grid step -> DMA'd once, stay in
        # VMEM; single-buffered (constant index_map needs no double buffer).
        return pl.BlockSpec(shape, lambda i: (0, 0),
                            pipeline_mode=pl.Buffered(1))

    out = pl.pallas_call(
        mlp_kernel,
        out_shape=jax.ShapeDtypeStruct((B_pad, OUT_PAD), jnp.float32),
        grid=(B_pad // TB,),
        in_specs=[
            pl.BlockSpec((TB, IN_RAW), lambda i: (i, 0)),   # x: batch-tiled, unpadded K
            resident((IN_RAW, H1)),
            resident((1, H1)),
            resident((H1, H2_PAD)),
            resident((1, H2_PAD)),
            resident((H2_PAD, OUT_PAD)),
            resident((1, OUT_PAD)),
        ],
        out_specs=pl.BlockSpec((TB, OUT_PAD), lambda i: (i, 0)),
        compiler_params=pltpu.CompilerParams(
            dimension_semantics=("parallel",)),   # v7x: shard batch across TCs
    )(xp, w1p, b1p, w2p, b2p, w3p, b3p)

    # Padded logit columns are exactly zero; slice back to the real shape so
    # downstream argmax/softmax never sees the zero pad lanes.
    return out[:B, :OUT_RAW]


def init_params(key):
    """nn.Linear-style init; weights stored (in_features, out_features)."""
    dims = [(IN_RAW, H1), (H1, H2_RAW), (H2_RAW, OUT_RAW)]
    params = []
    for i, (fan_in, fan_out) in enumerate(dims):
        kw, kb = jax.random.split(jax.random.fold_in(key, i))
        bound = 1.0 / (fan_in ** 0.5)
        w = jax.random.uniform(kw, (fan_in, fan_out), jnp.float32, -bound, bound)
        b = jax.random.uniform(kb, (fan_out,), jnp.float32, -bound, bound)
        params += [w, b]
    return params


def reference_forward(x, w1, b1, w2, b2, w3, b3):
    h1 = jnp.maximum(x @ w1 + b1, 0.0)
    h2 = jnp.maximum(h1 @ w2 + b2, 0.0)
    return h2 @ w3 + b3


if __name__ == "__main__":
    key = jax.random.PRNGKey(0)
    kx, kp = jax.random.split(key)

    B = 8  # small demo batch
    x = jax.random.normal(kx, (B, IN_RAW), jnp.float32)
    w1, b1, w2, b2, w3, b3 = init_params(kp)

    params = prepare_params(w1, b1, w2, b2, w3, b3)   # one-time prep
    out = net_forward(x, params)
    out = jax.block_until_ready(out)

    ref = reference_forward(x, w1, b1, w2, b2, w3, b3)
    assert out.shape == (B, OUT_RAW)
    # bf16 operands / fp32 accumulation: loosen tolerance vs fp32 reference.
    assert jnp.allclose(out, ref, atol=3e-2, rtol=3e-2), (
        float(jnp.max(jnp.abs(out - ref))))

    print("KERNEL_OK")
</pallas_src>

<mosaic_0001>
module attributes {stable_mosaic.version = 11 : i64} {
  func.func @mlp_kernel(%arg0: i32, %arg1: memref<16x784xf32, #tpu.memory_space<vmem>>, %arg2: memref<784x256xbf16, #tpu.memory_space<vmem>>, %arg3: memref<1x256xf32, #tpu.memory_space<vmem>>, %arg4: memref<256x128xbf16, #tpu.memory_space<vmem>>, %arg5: memref<1x128xf32, #tpu.memory_space<vmem>>, %arg6: memref<128x128xbf16, #tpu.memory_space<vmem>>, %arg7: memref<1x128xf32, #tpu.memory_space<vmem>>, %arg8: memref<16x128xf32, #tpu.memory_space<vmem>>) attributes {dimension_semantics = [#tpu.dimension_semantics<parallel>], iteration_bounds = array<i64: 1>, scalar_prefetch = 0 : i64, scratch_operands = 0 : i64, tpu.core_type = #tpu.core_type<tc>, window_params = [{transform_indices = @transform_0, window_bounds = array<i64: 16, 784>}, {pipeline_mode = #tpu.pipeline_mode<synchronous>, transform_indices = @transform_1, window_bounds = array<i64: 784, 256>}, {pipeline_mode = #tpu.pipeline_mode<synchronous>, transform_indices = @transform_2, window_bounds = array<i64: 1, 256>}, {pipeline_mode = #tpu.pipeline_mode<synchronous>, transform_indices = @transform_3, window_bounds = array<i64: 256, 128>}, {pipeline_mode = #tpu.pipeline_mode<synchronous>, transform_indices = @transform_4, window_bounds = array<i64: 1, 128>}, {pipeline_mode = #tpu.pipeline_mode<synchronous>, transform_indices = @transform_5, window_bounds = array<i64: 128, 128>}, {pipeline_mode = #tpu.pipeline_mode<synchronous>, transform_indices = @transform_6, window_bounds = array<i64: 1, 128>}, {transform_indices = @transform_7, window_bounds = array<i64: 16, 128>}]} {
    %c0 = arith.constant 0 : index
    %c0_0 = arith.constant 0 : index
    %0 = vector.load %arg1[%c0, %c0_0] : memref<16x784xf32, #tpu.memory_space<vmem>>, vector<16x784xf32>
    %1 = arith.truncf %0 : vector<16x784xf32> to vector<16x784xbf16>
    %c0_1 = arith.constant 0 : index
    %c0_2 = arith.constant 0 : index
    %2 = vector.load %arg2[%c0_1, %c0_2] : memref<784x256xbf16, #tpu.memory_space<vmem>>, vector<784x256xbf16>
    %cst = arith.constant dense<0.000000e+00> : vector<16x256xf32>
    %3 = tpu.matmul %1, %2, %cst {dimension_numbers = #tpu.dot_dimension_numbers<[1], [0], [0], [1], [0, 0, 1, 1], [], []>} : vector<16x784xbf16>, vector<784x256xbf16>, vector<16x256xf32> -> vector<16x256xf32>
    %c0_3 = arith.constant 0 : index
    %c0_4 = arith.constant 0 : index
    %4 = vector.load %arg3[%c0_3, %c0_4] : memref<1x256xf32, #tpu.memory_space<vmem>>, vector<1x256xf32>
    %5 = vector.broadcast %4 : vector<1x256xf32> to vector<16x256xf32>
    %6 = arith.addf %3, %5 : vector<16x256xf32>
    %cst_5 = arith.constant 0.000000e+00 : f32
    %7 = vector.broadcast %cst_5 : f32 to vector<16x256xf32>
    %8 = arith.maximumf %6, %7 : vector<16x256xf32>
    %9 = arith.truncf %8 : vector<16x256xf32> to vector<16x256xbf16>
    %c0_6 = arith.constant 0 : index
    %c0_7 = arith.constant 0 : index
    %10 = vector.load %arg4[%c0_6, %c0_7] : memref<256x128xbf16, #tpu.memory_space<vmem>>, vector<256x128xbf16>
    %cst_8 = arith.constant dense<0.000000e+00> : vector<16x128xf32>
    %11 = tpu.matmul %9, %10, %cst_8 {dimension_numbers = #tpu.dot_dimension_numbers<[1], [0], [0], [1], [0, 0, 1, 1], [], []>} : vector<16x256xbf16>, vector<256x128xbf16>, vector<16x128xf32> -> vector<16x128xf32>
    %c0_9 = arith.constant 0 : index
    %c0_10 = arith.constant 0 : index
    %12 = vector.load %arg5[%c0_9, %c0_10] : memref<1x128xf32, #tpu.memory_space<vmem>>, vector<1x128xf32>
    %13 = vector.broadcast %12 : vector<1x128xf32> to vector<16x128xf32>
    %14 = arith.addf %11, %13 : vector<16x128xf32>
    %cst_11 = arith.constant 0.000000e+00 : f32
    %15 = vector.broadcast %cst_11 : f32 to vector<16x128xf32>
    %16 = arith.maximumf %14, %15 : vector<16x128xf32>
    %17 = arith.truncf %16 : vector<16x128xf32> to vector<16x128xbf16>
    %c0_12 = arith.constant 0 : index
    %c0_13 = arith.constant 0 : index
    %18 = vector.load %arg6[%c0_12, %c0_13] : memref<128x128xbf16, #tpu.memory_space<vmem>>, vector<128x128xbf16>
    %cst_14 = arith.constant dense<0.000000e+00> : vector<16x128xf32>
    %19 = tpu.matmul %17, %18, %cst_14 {dimension_numbers = #tpu.dot_dimension_numbers<[1], [0], [0], [1], [0, 0, 1, 1], [], []>} : vector<16x128xbf16>, vector<128x128xbf16>, vector<16x128xf32> -> vector<16x128xf32>
    %c0_15 = arith.constant 0 : index
    %c0_16 = arith.constant 0 : index
    %20 = vector.load %arg7[%c0_15, %c0_16] : memref<1x128xf32, #tpu.memory_space<vmem>>, vector<1x128xf32>
    %21 = vector.broadcast %20 : vector<1x128xf32> to vector<16x128xf32>
    %22 = arith.addf %19, %21 : vector<16x128xf32>
    %c0_17 = arith.constant 0 : index
    %c0_18 = arith.constant 0 : index
    %23 = vector.load %arg8[%c0_17, %c0_18] : memref<16x128xf32, #tpu.memory_space<vmem>>, vector<16x128xf32>
    tpu.vector_store %arg8[%c0_17, %c0_18], %22 {strides = array<i32>} : memref<16x128xf32, #tpu.memory_space<vmem>>, vector<16x128xf32>,
    return
  }
  func.func @transform_0(%arg0: i32) -> (i32, i32) {
    %c0_i32 = arith.constant 0 : i32
    %c0_i32_0 = arith.constant 0 : i32
    return %arg0, %c0_i32 : i32, i32
  }
  func.func @transform_1(%arg0: i32) -> (i32, i32) {
    %c0_i32 = arith.constant 0 : i32
    %c0_i32_0 = arith.constant 0 : i32
    %c0_i32_1 = arith.constant 0 : i32
    return %c0_i32, %c0_i32_0 : i32, i32
  }
  func.func @transform_2(%arg0: i32) -> (i32, i32) {
    %c0_i32 = arith.constant 0 : i32
    %c0_i32_0 = arith.constant 0 : i32
    %c0_i32_1 = arith.constant 0 : i32
    return %c0_i32, %c0_i32_0 : i32, i32
  }
  func.func @transform_3(%arg0: i32) -> (i32, i32) {
    %c0_i32 = arith.constant 0 : i32
    %c0_i32_0 = arith.constant 0 : i32
    %c0_i32_1 = arith.constant 0 : i32
    return %c0_i32, %c0_i32_0 : i32, i32
  }
  func.func @transform_4(%arg0: i32) -> (i32, i32) {
    %c0_i32 = arith.constant 0 : i32
    %c0_i32_0 = arith.constant 0 : i32
    %c0_i32_1 = arith.constant 0 : i32
    return %c0_i32, %c0_i32_0 : i32, i32
  }
  func.func @transform_5(%arg0: i32) -> (i32, i32) {
    %c0_i32 = arith.constant 0 : i32
    %c0_i32_0 = arith.constant 0 : i32
    %c0_i32_1 = arith.constant 0 : i32
    return %c0_i32, %c0_i32_0 : i32, i32
  }
  func.func @transform_6(%arg0: i32) -> (i32, i32) {
    %c0_i32 = arith.constant 0 : i32
    %c0_i32_0 = arith.constant 0 : i32
    %c0_i32_1 = arith.constant 0 : i32
    return %c0_i32, %c0_i32_0 : i32, i32
  }
  func.func @transform_7(%arg0: i32) -> (i32, i32) {
    %c0_i32 = arith.constant 0 : i32
    %c0_i32_0 = arith.constant 0 : i32
    return %arg0, %c0_i32 : i32, i32
  }
}

</mosaic_0001>

<bundles_post_ra>
// kernel: tpu_custom_call.1
= control target key start
LH: loop header
LB: loop body
LE: loop exit
PB: predicated region body
PF: predicated region fallthrough
CT: control target
= control target key end

     0   :  { %12 = vsyncpa [#allocation3], 0  ;;  %s2087_s0 = inlined_call_operand.hbm [shape: f32[16,784], index: 0, kind: input, shape index: {}]   ;;  %s2088_s1 = inlined_call_operand.hbm [shape: bf16[784,256], index: 1, kind: input, shape index: {}]   ;;  %s2089_s2 = inlined_call_operand.hbm [shape: f32[1,256], index: 2, kind: input, shape index: {}]   ;;  %s2090_s3 = inlined_call_operand.hbm [shape: bf16[256,128], index: 3, kind: input, shape index: {}]   ;;  %s2091_s4 = inlined_call_operand.vmem [shape: f32[1,128], index: 4, kind: input, shape index: {}]   ;;  %s2092_s5 = inlined_call_operand.hbm [shape: bf16[128,128], index: 5, kind: input, shape index: {}]   ;;  %s2093_s6 = inlined_call_operand.vmem [shape: f32[1,128], index: 6, kind: input, shape index: {}]   ;;  %s2094_s7 = inlined_call_operand.hbm [shape: f32[16,128], index: 7, kind: output, shape index: {}]  }
   0x1   :  { %13 = vsyncpa [#allocation6], 0 }
   0x2   :  { %14 = vsyncpa [#allocation9], 0  ;;  %s33_s26 = sshll.u32 %s2088_s1, 4  ;;  %s34_s26 = int_to_ptr.hbm [resolvable:$true] %s33_s26 }
   0x3   :  { %15 = vsyncpa [#allocation4], 0  ;;  %s1971_s27 = smov [#allocation5]   ;;  %s57_s8 = sshll.u32 %s2090_s3, 4  ;;  %s58_s8 = int_to_ptr.hbm [resolvable:$true] %s57_s8 }
   0x4   :  { %s35_s28 = sshll.u32 %s1971_s27, 4  ;;  %s1972_s9 = smov 128   ;;  %s36_s28 = int_to_ptr.vmem [resolvable:$true] %s35_s28 }
   0x5   :  { %s1973_s10 = smov 8   ;;  %s1974_s11 = smov [#allocation8]  }
   0x6   :  { %41 = dma.hbm_to_vmem [thread:$0]  %s34_s26, 12544, %s36_s28, [#allocation6], %s1972_s9, %s1972_s9, %s1973_s10  }
   0x7   :  { %s59_s12 = sshll.u32 %s1974_s11, 4  ;;  %s1975_s1 = smov 64   ;;  %s60_s12 = int_to_ptr.vmem [resolvable:$true] %s59_s12 }
   0x8   :  { %s1976_s13 = smov 4   ;;  %s20_s16 = sshll.u32 %s2087_s0, 4  ;;  %s21_s16 = int_to_ptr.hbm [resolvable:$true] %s20_s16 }
   0x9   :  { %65 = dma.hbm_to_vmem [thread:$0]  %s58_s8, 2048, %s60_s12, [#allocation9], %s1975_s1, %s1975_s1, %s1976_s13  }
   0xa   :  { %s1977_s17 = smov [#allocation2]   ;;  %s47_s20 = sshll.u32 %s2089_s2, 4  ;;  %s48_s20 = int_to_ptr.hbm [resolvable:$true] %s47_s20 }
   0xb   :  { %s22_s3 = sshll.u32 %s1977_s17, 4  ;;  %s1978_s21 = smov 896   ;;  %s23_s3 = int_to_ptr.vmem [resolvable:$true] %s22_s3 }
   0xc   :  { %s1979_s22 = smov 56   ;;  %s1980_s23 = smov [#allocation7]  }
   0xd   :  { %28 = dma.hbm_to_vmem [thread:$0]  %s21_s16, 1792, %s23_s3, [#allocation3], %s1978_s21, %s1978_s21, %s1979_s22  }
   0xe   :  { %s49_s24 = sshll.u32 %s1980_s23, 4  ;;  %s72_s27 = sshll.u32 %s2092_s5, 4  ;;  %s50_s24 = int_to_ptr.vmem [resolvable:$true] %s49_s24  ;;  %s73_s27 = int_to_ptr.hbm [resolvable:$true] %s72_s27 }
   0xf   :  { %52 = dma.hbm_to_vmem [thread:$0]  %s48_s20, 32, %s50_s24, [#allocation6]  }
  0x10   :  { %s1981_s0 = smov [#allocation10]  }
  0x11   :  { %s74_s28 = sshll.u32 %s1981_s0, 4  ;;  %s75_s28 = int_to_ptr.vmem [resolvable:$true] %s74_s28 }
  0x12   :  { %80 = dma.hbm_to_vmem [thread:$0]  %s73_s27, 1024, %s75_s28, [#allocation9], %s1975_s1, %s1975_s1, %s1976_s13  }
  0x13   :  { %1963 = dma.done.wait [#allocation3], 1792  }
  0x14   :  { %1964 = vsyncadd [#allocation3], 4294965504 }
  0x15   :  { %1965 = dma.done.wait [#allocation6], 12576  }
  0x16   :  { %1966 = vsyncadd [#allocation6], 4294954720 }
  0x17   :  { %1967 = dma.done.wait [#allocation9], 3072  }
  0x18   :  { %1968 = vsyncadd [#allocation9], 4294964224  ;;  %v1251_v0 = vld [vmem:[#allocation5 + $0x70] sm:$0xf]  ;;  %v1698_v1 = vld [vmem:[#allocation5 + $0x74] sm:$0xf0] }
  0x19   :  { %v1379_v2 = vld [vmem:[#allocation5 + $0x170] sm:$0xf]  ;;  %v1252_v3 = vor.u32 %v1698_v1, %v1251_v0  ;;  %v1730_v4 = vld [vmem:[#allocation5 + $0x174] sm:$0xf0]  ;;  %v1243_v11 = vld [vmem:[#allocation5 + $0x60] sm:$0xf] }
  0x1a   :  { %v1443_v5 = vld [vmem:[#allocation5 + $0x1f0] sm:$0xf]  ;;  %v1746_v6 = vld [vmem:[#allocation5 + $0x1f4] sm:$0xf0]  ;;  %v1380_v7 = vor.u32 %v1730_v4, %v1379_v2  ;;  %v1696_v13 = vld [vmem:[#allocation5 + $0x64] sm:$0xf0] }
  0x1b   :  { %v1444_v8 = vor.u32 %v1746_v6, %v1443_v5  ;;  %v1315_v9 = vld [vmem:[#allocation5 + $0xf0] sm:$0xf]  ;;  %v1714_v10 = vld [vmem:[#allocation5 + $0xf4] sm:$0xf0]  ;;  %723 = vmatpush.bf16.msra.mxu0 %v1252_v3  ;;  %v1371_v14 = vld [vmem:[#allocation5 + $0x160] sm:$0xf]  ;;  %v1244_v16 = vor.u32 %v1696_v13, %v1243_v11 }
  0x1c   :  { %v1316_v12 = vor.u32 %v1714_v10, %v1315_v9  ;;  %v1728_v15 = vld [vmem:[#allocation5 + $0x164] sm:$0xf0]  ;;  %751 = vmatpush.bf16.msra.mxu2 %v1380_v7  ;;  %v1435_v18 = vld [vmem:[#allocation5 + $0x1e0] sm:$0xf]  ;;  %v1235_v23 = vld [vmem:[#allocation5 + $0x50] sm:$0xf] }
  0x1d   :  { %765 = vmatpush.bf16.msra.mxu3 %v1444_v8  ;;  %v1372_v17 = vor.u32 %v1728_v15, %v1371_v14  ;;  %v1744_v19 = vld [vmem:[#allocation5 + $0x1e4] sm:$0xf0]  ;;  %v1307_v20 = vld [vmem:[#allocation5 + $0xe0] sm:$0xf]  ;;  %v1694_v24 = vld [vmem:[#allocation5 + $0x54] sm:$0xf0] }
  0x1e   :  { %737 = vmatpush.bf16.msra.mxu1 %v1316_v12  ;;  %v1436_v21 = vor.u32 %v1744_v19, %v1435_v18  ;;  %v1712_v22 = vld [vmem:[#allocation5 + $0xe4] sm:$0xf0]  ;;  %v1363_v26 = vld [vmem:[#allocation5 + $0x150] sm:$0xf]  ;;  %v1726_v27 = vld [vmem:[#allocation5 + $0x154] sm:$0xf0]  ;;  %v1236_v29 = vor.u32 %v1694_v24, %v1235_v23 }
  0x1f   :  { %v1308_v25 = vor.u32 %v1712_v22, %v1307_v20  ;;  %v1427_v28 = vld [vmem:[#allocation5 + $0x1d0] sm:$0xf]  ;;  %724 = vmatpush.bf16.msra.mxu0 %v1244_v16  ;;  %v1742_v30 = vld [vmem:[#allocation5 + $0x1d4] sm:$0xf0]  ;;  %v1364_v33 = vor.u32 %v1726_v27, %v1363_v26  ;;  %v1227_v35 = vld [vmem:[#allocation5 + $0x40] sm:$0xf] }
  0x20   :  { %v1299_v31 = vld [vmem:[#allocation5 + $0xd0] sm:$0xf]  ;;  %v1710_v32 = vld [vmem:[#allocation5 + $0xd4] sm:$0xf0]  ;;  %752 = vmatpush.bf16.msra.mxu2 %v1372_v17  ;;  %v1428_v34 = vor.u32 %v1742_v30, %v1427_v28  ;;  %v1692_v36 = vld [vmem:[#allocation5 + $0x44] sm:$0xf0] }
  0x21   :  { %766 = vmatpush.bf16.msra.mxu3 %v1436_v21  ;;  %v1355_v37 = vld [vmem:[#allocation5 + $0x140] sm:$0xf]  ;;  %v1300_v38 = vor.u32 %v1710_v32, %v1299_v31  ;;  %v1724_v39 = vld [vmem:[#allocation5 + $0x144] sm:$0xf0]  ;;  %v1228_v44 = vor.u32 %v1692_v36, %v1227_v35  ;;  %v1219_v47 = vld [vmem:[#allocation5 + $0x30] sm:$0xf] }
  0x22   :  { %738 = vmatpush.bf16.msra.mxu1 %v1308_v25  ;;  %v1419_v40 = vld [vmem:[#allocation5 + $0x1c0] sm:$0xf]  ;;  %v1740_v41 = vld [vmem:[#allocation5 + $0x1c4] sm:$0xf0]  ;;  %v1356_v45 = vor.u32 %v1724_v39, %v1355_v37  ;;  %v1690_v48 = vld [vmem:[#allocation5 + $0x34] sm:$0xf0] }
  0x23   :  { %v1291_v42 = vld [vmem:[#allocation5 + $0xc0] sm:$0xf]  ;;  %v1708_v43 = vld [vmem:[#allocation5 + $0xc4] sm:$0xf0]  ;;  %725 = vmatpush.bf16.msra.mxu0 %v1236_v29  ;;  %v1420_v46 = vor.u32 %v1740_v41, %v1419_v40  ;;  %v1347_v49 = vld [vmem:[#allocation5 + $0x130] sm:$0xf]  ;;  %v1220_v56 = vor.u32 %v1690_v48, %v1219_v47 }
  0x24   :  { %753 = vmatpush.bf16.msra.mxu2 %v1364_v33  ;;  %v1292_v50 = vor.u32 %v1708_v43, %v1291_v42  ;;  %v1722_v51 = vld [vmem:[#allocation5 + $0x134] sm:$0xf0]  ;;  %v1411_v52 = vld [vmem:[#allocation5 + $0x1b0] sm:$0xf]  ;;  %v1211_v59 = vld [vmem:[#allocation5 + $0x20] sm:$0xf] }
  0x25   :  { %767 = vmatpush.bf16.msra.mxu3 %v1428_v34  ;;  %v1738_v53 = vld [vmem:[#allocation5 + $0x1b4] sm:$0xf0]  ;;  %v1283_v54 = vld [vmem:[#allocation5 + $0xb0] sm:$0xf]  ;;  %v1348_v57 = vor.u32 %v1722_v51, %v1347_v49  ;;  %v1688_v60 = vld [vmem:[#allocation5 + $0x24] sm:$0xf0] }
  0x26   :  { %739 = vmatpush.bf16.msra.mxu1 %v1300_v38  ;;  %v1706_v55 = vld [vmem:[#allocation5 + $0xb4] sm:$0xf0]  ;;  %v1412_v58 = vor.u32 %v1738_v53, %v1411_v52  ;;  %v1339_v61 = vld [vmem:[#allocation5 + $0x120] sm:$0xf]  ;;  %v1720_v63 = vld [vmem:[#allocation5 + $0x124] sm:$0xf0]  ;;  %v1212_v4 = vor.u32 %v1688_v60, %v1211_v59 }
  0x27   :  { %726 = vmatpush.bf16.msra.mxu0 %v1228_v44  ;;  %v1284_v62 = vor.u32 %v1706_v55, %v1283_v54  ;;  %v1403_v0 = vld [vmem:[#allocation5 + $0x1a0] sm:$0xf]  ;;  %v1736_v1 = vld [vmem:[#allocation5 + $0x1a4] sm:$0xf0]  ;;  %v1203_v5 = vld [vmem:[#allocation5 + $0x10] sm:$0xf]  ;;  %v1340_v6 = vor.u32 %v1720_v63, %v1339_v61 }
  0x28   :  { %754 = vmatpush.bf16.msra.mxu2 %v1356_v45  ;;  %v1275_v2 = vld [vmem:[#allocation5 + $0xa0] sm:$0xf]  ;;  %v1704_v3 = vld [vmem:[#allocation5 + $0xa4] sm:$0xf0]  ;;  %v1404_v7 = vor.u32 %v1736_v1, %v1403_v0  ;;  %v1686_v8 = vld [vmem:[#allocation5 + $0x14] sm:$0xf0] }
  0x29   :  { %768 = vmatpush.bf16.msra.mxu3 %v1420_v46  ;;  %v1331_v9 = vld [vmem:[#allocation5 + $0x110] sm:$0xf]  ;;  %v1718_v10 = vld [vmem:[#allocation5 + $0x114] sm:$0xf0]  ;;  %v1276_v11 = vor.u32 %v1704_v3, %v1275_v2  ;;  %v1195_v16 = vld [vmem:[#allocation5] sm:$0xf]  ;;  %v1204_v18 = vor.u32 %v1686_v8, %v1203_v5 }
  0x2a   :  { %740 = vmatpush.bf16.msra.mxu1 %v1292_v50  ;;  %v1395_v12 = vld [vmem:[#allocation5 + $0x190] sm:$0xf]  ;;  %v1734_v13 = vld [vmem:[#allocation5 + $0x194] sm:$0xf0]  ;;  %v1684_v17 = vld [vmem:[#allocation5 + $0x4] sm:$0xf0]  ;;  %v1332_v23 = vor.u32 %v1718_v10, %v1331_v9 }
  0x2b   :  { %727 = vmatpush.bf16.msra.mxu0 %v1220_v56  ;;  %v1267_v14 = vld [vmem:[#allocation5 + $0x90] sm:$0xf]  ;;  %v1702_v15 = vld [vmem:[#allocation5 + $0x94] sm:$0xf0]  ;;  %v1323_v19 = vld [vmem:[#allocation5 + $0x100] sm:$0xf]  ;;  %v1396_v24 = vor.u32 %v1734_v13, %v1395_v12  ;;  %v1196_v35 = vor.u32 %v1684_v17, %v1195_v16 }
  0x2c   :  { %755 = vmatpush.bf16.msra.mxu2 %v1348_v57  ;;  %v1716_v20 = vld [vmem:[#allocation5 + $0x104] sm:$0xf0]  ;;  %v1387_v21 = vld [vmem:[#allocation5 + $0x180] sm:$0xf]  ;;  %v1507_v25 = vld [vmem:[#allocation5 + $0x270] sm:$0xf]  ;;  %v1268_v28 = vor.u32 %v1702_v15, %v1267_v14 }
  0x2d   :  { %769 = vmatpush.bf16.msra.mxu3 %v1412_v58  ;;  %v1732_v22 = vld [vmem:[#allocation5 + $0x184] sm:$0xf0]  ;;  %v1762_v26 = vld [vmem:[#allocation5 + $0x274] sm:$0xf0]  ;;  %v1697_v27 = vld [vmem:[#allocation5 + $0x74] sm:$0xf]  ;;  %v1324_v39 = vor.u32 %v1716_v20, %v1323_v19 }
  0x2e   :  { %741 = vmatpush.bf16.msra.mxu1 %v1284_v62  ;;  %v1253_v29 = vld [vmem:[#allocation5 + $0x78] sm:$0xf0]  ;;  %v1259_v30 = vld [vmem:[#allocation5 + $0x80] sm:$0xf]  ;;  %v1700_v31 = vld [vmem:[#allocation5 + $0x84] sm:$0xf0]  ;;  %v1388_v40 = vor.u32 %v1732_v22, %v1387_v21  ;;  %v1508_v44 = vor.u32 %v1762_v26, %v1507_v25 }
  0x2f   :  { %728 = vmatpush.bf16.msra.mxu0 %v1212_v4  ;;  %v106_v32 = vld [vmem:[#allocation2 + $0x10] sm:$0xff]  ;;  %v113_v33 = vld [vmem:[#allocation2 + $0x48] sm:$0xff]  ;;  %v1571_v34 = vld [vmem:[#allocation5 + $0x2f0] sm:$0xf]  ;;  %v1256_v45 = vor.u32 %v1697_v27, %v1253_v29  ;;  %v1260_v49 = vor.u32 %v1700_v31, %v1259_v30  ;;  %vm719_vm0 = vcmask 130048   ;;  %s1982_s8 = smov [#allocation11]  }
  0x30   :  { %756 = vmatpush.bf16.msra.mxu2 %v1340_v6  ;;  %v1778_v36 = vld [vmem:[#allocation5 + $0x2f4] sm:$0xf0]  ;;  %v1579_v37 = vld [vmem:[#allocation5 + $0x300] sm:$0xf]  ;;  %v1780_v38 = vld [vmem:[#allocation5 + $0x304] sm:$0xf0]  ;;  %v2041_v54 = vpack.c.bf16 %v113_v33, %v106_v32 }
  0x31   :  { %770 = vmatpush.bf16.msra.mxu3 %v1404_v7  ;;  %v1713_v41 = vld [vmem:[#allocation5 + $0xf4] sm:$0xf]  ;;  %v1317_v42 = vld [vmem:[#allocation5 + $0xf8] sm:$0xf0]  ;;  %v111_v46 = vld [vmem:[#allocation2 + $0x38] sm:$0xff]  ;;  %v1580_v50 = vor.u32 %v1780_v38, %v1579_v37  ;;  %v1572_v55 = vor.u32 %v1778_v36, %v1571_v34  ;;  %s1176_s11 = sshll.u32 %s1982_s8, 4  ;;  %s1177_s11 = int_to_ptr.vmem [resolvable:$true] %s1176_s11 }
  0x32   :  { %742 = vmatpush.bf16.msra.mxu1 %v1276_v11  ;;  %v104_v43 = vld [vmem:[#allocation2] sm:$0xff]  ;;  %v107_v47 = vld [vmem:[#allocation2 + $0x18] sm:$0xff]  ;;  %v114_v48 = vld [vmem:[#allocation2 + $0x50] sm:$0xff]  ;;  %v1320_v59 = vor.u32 %v1713_v41, %v1317_v42  ;;  %s1178_s1 = sshll.u32 %s2094_s7, 4  ;;  %s1179_s1 = int_to_ptr.hbm [resolvable:$true] %s1178_s1 }
  0x33   :  { %729 = vmatpush.bf16.msra.mxu0 %v1204_v18  ;;  %v1499_v51 = vld [vmem:[#allocation5 + $0x260] sm:$0xf]  ;;  %v1760_v52 = vld [vmem:[#allocation5 + $0x264] sm:$0xf0]  ;;  %v1695_v53 = vld [vmem:[#allocation5 + $0x64] sm:$0xf]  ;;  %v2043_v60 = vpack.c.bf16 %v111_v46, %v104_v43  ;;  %v2045_v63 = vpack.c.bf16 %v114_v48, %v107_v47 }
  0x34   :  { %757 = vmatpush.bf16.msra.mxu2 %v1332_v23  ;;  %v1245_v56 = vld [vmem:[#allocation5 + $0x68] sm:$0xf0]  ;;  %v105_v57 = vld [vmem:[#allocation2 + $0x8] sm:$0xff]  ;;  %v112_v58 = vld [vmem:[#allocation2 + $0x40] sm:$0xff]  ;;  %v1500_v0 = vor.u32 %v1760_v52, %v1499_v51 }
  0x35   :  { %771 = vmatpush.bf16.msra.mxu3 %v1396_v24  ;;  %v1563_v61 = vld [vmem:[#allocation5 + $0x2e0] sm:$0xf]  ;;  %v1776_v62 = vld [vmem:[#allocation5 + $0x2e4] sm:$0xf0]  ;;  %v1711_v1 = vld [vmem:[#allocation5 + $0xe4] sm:$0xf]  ;;  %v1248_v3 = vor.u32 %v1695_v53, %v1245_v56  ;;  %v2047_v4 = vpack.c.bf16 %v112_v58, %v105_v57 }
  0x36   :  { %743 = vmatpush.bf16.msra.mxu1 %v1268_v28  ;;  %v1309_v2 = vld [vmem:[#allocation5 + $0xe8] sm:$0xf0]  ;;  %v1491_v5 = vld [vmem:[#allocation5 + $0x250] sm:$0xf]  ;;  %v1758_v6 = vld [vmem:[#allocation5 + $0x254] sm:$0xf0]  ;;  %v1564_v7 = vor.u32 %v1776_v62, %v1563_v61 }
  0x37   :  { %730 = vmatpush.bf16.msra.mxu0 %v1196_v35  ;;  %v1693_v8 = vld [vmem:[#allocation5 + $0x54] sm:$0xf]  ;;  %v1237_v9 = vld [vmem:[#allocation5 + $0x58] sm:$0xf0]  ;;  %v1312_v10 = vor.u32 %v1711_v1, %v1309_v2  ;;  %v1555_v11 = vld [vmem:[#allocation5 + $0x2d0] sm:$0xf]  ;;  %v1492_v13 = vor.u32 %v1758_v6, %v1491_v5 }
  0x38   :  { %758 = vmatpush.bf16.msra.mxu2 %v1324_v39  ;;  %v1774_v12 = vld [vmem:[#allocation5 + $0x2d4] sm:$0xf0]  ;;  %v1709_v14 = vld [vmem:[#allocation5 + $0xd4] sm:$0xf]  ;;  %v1301_v15 = vld [vmem:[#allocation5 + $0xd8] sm:$0xf0]  ;;  %v1240_v16 = vor.u32 %v1693_v8, %v1237_v9 }
  0x39   :  { %772 = vmatpush.bf16.msra.mxu3 %v1388_v40  ;;  %v1483_v17 = vld [vmem:[#allocation5 + $0x240] sm:$0xf]  ;;  %v1756_v18 = vld [vmem:[#allocation5 + $0x244] sm:$0xf0]  ;;  %v1556_v19 = vor.u32 %v1774_v12, %v1555_v11  ;;  %v1691_v20 = vld [vmem:[#allocation5 + $0x44] sm:$0xf]  ;;  %v1304_v22 = vor.u32 %v1709_v14, %v1301_v15 }
  0x3a   :  { %744 = vmatpush.bf16.msra.mxu1 %v1260_v49  ;;  %731 = vmatmul.bf16.vlgmr.msra.gmra.mxu0 %v2043_v60  ;;  %v1229_v21 = vld [vmem:[#allocation5 + $0x48] sm:$0xf0]  ;;  %v1547_v23 = vld [vmem:[#allocation5 + $0x2c0] sm:$0xf]  ;;  %v1772_v24 = vld [vmem:[#allocation5 + $0x2c4] sm:$0xf0]  ;;  %v1484_v25 = vor.u32 %v1756_v18, %v1483_v17 }
  0x3b   :  { %779 = vmatpush.bf16.msrb.mxu0 %v1508_v44  ;;  %759 = vmatmul.bf16.vlgmr.msra.gmra.mxu2 %v2041_v54  ;;  %v1707_v26 = vld [vmem:[#allocation5 + $0xc4] sm:$0xf]  ;;  %v1293_v27 = vld [vmem:[#allocation5 + $0xc8] sm:$0xf0]  ;;  %v1232_v28 = vor.u32 %v1691_v20, %v1229_v21  ;;  %v1475_v29 = vld [vmem:[#allocation5 + $0x230] sm:$0xf]  ;;  %v1548_v31 = vor.u32 %v1772_v24, %v1547_v23 }
  0x3c   :  { %814 = vmatpush.bf16.msrb.mxu2 %v1580_v50  ;;  %773 = vmatmul.bf16.vlgmr.msra.gmra.mxu3 %v2045_v63  ;;  %v1754_v30 = vld [vmem:[#allocation5 + $0x234] sm:$0xf0]  ;;  %v1689_v32 = vld [vmem:[#allocation5 + $0x34] sm:$0xf]  ;;  %v1221_v33 = vld [vmem:[#allocation5 + $0x38] sm:$0xf0]  ;;  %v1296_v35 = vor.u32 %v1707_v26, %v1293_v27 }
  0x3d   :  { %821 = vmatpush.bf16.msrb.mxu3 %v1256_v45  ;;  %745 = vmatmul.bf16.vlgmr.msra.gmra.mxu1 %v2047_v4  ;;  %v1539_v34 = vld [vmem:[#allocation5 + $0x2b0] sm:$0xf]  ;;  %v1770_v36 = vld [vmem:[#allocation5 + $0x2b4] sm:$0xf0]  ;;  %v110_v37 = vld [vmem:[#allocation2 + $0x30] sm:$0xff]  ;;  %v1476_v39 = vor.u32 %v1754_v30, %v1475_v29  ;;  %v1224_v42 = vor.u32 %v1689_v32, %v1221_v33 }
  0x3e   :  { %793 = vmatpush.bf16.msrb.mxu1 %v1572_v55  ;;  %v117_v38 = vld [vmem:[#allocation2 + $0x68] sm:$0xff]  ;;  %v1705_v40 = vld [vmem:[#allocation5 + $0xb4] sm:$0xf]  ;;  %v1467_v43 = vld [vmem:[#allocation5 + $0x220] sm:$0xf]  ;;  %v1540_v45 = vor.u32 %v1770_v36, %v1539_v34 }
  0x3f   :  { %780 = vmatpush.bf16.msrb.mxu0 %v1500_v0  ;;  %v1285_v41 = vld [vmem:[#allocation5 + $0xb8] sm:$0xf0]  ;;  %v1752_v44 = vld [vmem:[#allocation5 + $0x224] sm:$0xf0]  ;;  %v1687_v46 = vld [vmem:[#allocation5 + $0x24] sm:$0xf]  ;;  %v2053_v48 = vpack.c.bf16 %v117_v38, %v110_v37 }
  0x40   :  { %835 = vmatpush.bf16.msra.mxu2 %v1320_v59  ;;  %v1213_v47 = vld [vmem:[#allocation5 + $0x28] sm:$0xf0]  ;;  %v1288_v49 = vor.u32 %v1705_v40, %v1285_v41  ;;  %v1531_v50 = vld [vmem:[#allocation5 + $0x2a0] sm:$0xf]  ;;  %v1768_v51 = vld [vmem:[#allocation5 + $0x2a4] sm:$0xf0]  ;;  %v1468_v52 = vor.u32 %v1752_v44, %v1467_v43 }
  0x41   :  { %822 = vmatpush.bf16.msrb.mxu3 %v1248_v3  ;;  %v1703_v53 = vld [vmem:[#allocation5 + $0xa4] sm:$0xf]  ;;  %v1277_v55 = vld [vmem:[#allocation5 + $0xa8] sm:$0xf0]  ;;  %v1216_v56 = vor.u32 %v1687_v46, %v1213_v47  ;;  %v1459_v57 = vld [vmem:[#allocation5 + $0x210] sm:$0xf]  ;;  %v1532_v61 = vor.u32 %v1768_v51, %v1531_v50 }
  0x42   :  { %794 = vmatpush.bf16.msrb.mxu1 %v1564_v7  ;;  %v1750_v58 = vld [vmem:[#allocation5 + $0x214] sm:$0xf0]  ;;  %v1685_v59 = vld [vmem:[#allocation5 + $0x14] sm:$0xf]  ;;  %v1205_v62 = vld [vmem:[#allocation5 + $0x18] sm:$0xf0]  ;;  %v1280_v2 = vor.u32 %v1703_v53, %v1277_v55 }
  0x43   :  { %781 = vmatpush.bf16.msrb.mxu0 %v1492_v13  ;;  %v1523_v0 = vld [vmem:[#allocation5 + $0x290] sm:$0xf]  ;;  %v1766_v1 = vld [vmem:[#allocation5 + $0x294] sm:$0xf0]  ;;  %v1701_v3 = vld [vmem:[#allocation5 + $0x94] sm:$0xf]  ;;  %v1460_v7 = vor.u32 %v1750_v58, %v1459_v57  ;;  %v1208_v11 = vor.u32 %v1685_v59, %v1205_v62 }
  0x44   :  { %836 = vmatpush.bf16.msra.mxu2 %v1312_v10  ;;  %v1269_v5 = vld [vmem:[#allocation5 + $0x98] sm:$0xf0]  ;;  %v1451_v6 = vld [vmem:[#allocation5 + $0x200] sm:$0xf]  ;;  %v1748_v8 = vld [vmem:[#allocation5 + $0x204] sm:$0xf0]  ;;  %v1524_v15 = vor.u32 %v1766_v1, %v1523_v0 }
  0x45   :  { %823 = vmatpush.bf16.msrb.mxu3 %v1240_v16  ;;  %v1683_v9 = vld [vmem:[#allocation5 + $0x4] sm:$0xf]  ;;  %v1197_v10 = vld [vmem:[#allocation5 + $0x8] sm:$0xf0]  ;;  %v1729_v12 = vld [vmem:[#allocation5 + $0x174] sm:$0xf]  ;;  %v1452_v23 = vor.u32 %v1748_v8, %v1451_v6 }
  0x46   :  { %795 = vmatpush.bf16.msrb.mxu1 %v1556_v19  ;;  %v1381_v13 = vld [vmem:[#allocation5 + $0x178] sm:$0xf0]  ;;  %v1761_v14 = vld [vmem:[#allocation5 + $0x274] sm:$0xf]  ;;  %v1515_v17 = vld [vmem:[#allocation5 + $0x280] sm:$0xf]  ;;  %v1272_v19 = vor.u32 %v1701_v3, %v1269_v5  ;;  %v1200_v27 = vor.u32 %v1683_v9, %v1197_v10 }
  0x47   :  { %782 = vmatpush.bf16.msrb.mxu0 %v1484_v25  ;;  %v1509_v16 = vld [vmem:[#allocation5 + $0x278] sm:$0xf0]  ;;  %v1764_v18 = vld [vmem:[#allocation5 + $0x284] sm:$0xf0]  ;;  %v108_v20 = vld [vmem:[#allocation2 + $0x20] sm:$0xff] }
  0x48   :  { %837 = vmatpush.bf16.msra.mxu2 %v1304_v22  ;;  %v115_v21 = vld [vmem:[#allocation2 + $0x58] sm:$0xff]  ;;  %v1699_v22 = vld [vmem:[#allocation5 + $0x84] sm:$0xf]  ;;  %v1745_v25 = vld [vmem:[#allocation5 + $0x1f4] sm:$0xf]  ;;  %v1512_v32 = vor.u32 %v1761_v14, %v1509_v16  ;;  %v1516_v33 = vor.u32 %v1764_v18, %v1515_v17 }
  0x49   :  { %824 = vmatpush.bf16.msrb.mxu3 %v1232_v28  ;;  %v1261_v24 = vld [vmem:[#allocation5 + $0x88] sm:$0xf0]  ;;  %v1445_v26 = vld [vmem:[#allocation5 + $0x1f8] sm:$0xf0]  ;;  %v1384_v28 = vor.u32 %v1729_v12, %v1381_v13  ;;  %v1777_v29 = vld [vmem:[#allocation5 + $0x2f4] sm:$0xf]  ;;  %v2057_v37 = vpack.c.bf16 %v115_v21, %v108_v20 }
  0x4a   :  { %796 = vmatpush.bf16.msrb.mxu1 %v1548_v31  ;;  %v1573_v30 = vld [vmem:[#allocation5 + $0x2f8] sm:$0xf0]  ;;  %v116_v34 = vld [vmem:[#allocation2 + $0x60] sm:$0xff]  ;;  %v1373_v36 = vld [vmem:[#allocation5 + $0x168] sm:$0xf0]  ;;  %v1264_v38 = vor.u32 %v1699_v22, %v1261_v24  ;;  %v1448_v41 = vor.u32 %v1745_v25, %v1445_v26 }
  0x4b   :  { %783 = vmatpush.bf16.msrb.mxu0 %v1476_v39  ;;  %1585 = vmatmul.msk.bf16.vlgmr.msrb.gmra.mxu2 %vm719_vm0, %v2053_v48  ;;  %v109_v31 = vld [vmem:[#allocation2 + $0x28] sm:$0xff]  ;;  %v1759_v39 = vld [vmem:[#allocation5 + $0x264] sm:$0xf]  ;;  %v1501_v40 = vld [vmem:[#allocation5 + $0x268] sm:$0xf0] }
  0x4c   :  { %838 = vmatpush.bf16.msra.mxu2 %v1296_v35  ;;  %v1727_v35 = vld [vmem:[#allocation5 + $0x164] sm:$0xf]  ;;  %v2059_v44 = vpack.c.bf16 %v116_v34, %v109_v31  ;;  %v1437_v46 = vld [vmem:[#allocation5 + $0x1e8] sm:$0xf0]  ;;  %v1504_v50 = vor.u32 %v1759_v39, %v1501_v40  ;;  %v1725_v51 = vld [vmem:[#allocation5 + $0x154] sm:$0xf] }
  0x4d   :  { %825 = vmatpush.bf16.msrb.mxu3 %v1224_v42  ;;  %v1576_v42 = vor.u32 %v1777_v29, %v1573_v30  ;;  %v1743_v43 = vld [vmem:[#allocation5 + $0x1e4] sm:$0xf]  ;;  %v1757_v53 = vld [vmem:[#allocation5 + $0x254] sm:$0xf]  ;;  %v1493_v55 = vld [vmem:[#allocation5 + $0x258] sm:$0xf0] }
  0x4e   :  { %797 = vmatpush.bf16.msrb.mxu1 %v1540_v45  ;;  %v1376_v45 = vor.u32 %v1727_v35, %v1373_v36  ;;  %v1775_v47 = vld [vmem:[#allocation5 + $0x2e4] sm:$0xf]  ;;  %v1741_v58 = vld [vmem:[#allocation5 + $0x1d4] sm:$0xf]  ;;  %v1557_v0 = vld [vmem:[#allocation5 + $0x2d8] sm:$0xf0]  ;;  %v1496_v1 = vor.u32 %v1757_v53, %v1493_v55 }
  0x4f   :  { %784 = vmatpush.bf16.msrb.mxu0 %v1468_v52  ;;  %v1365_v52 = vld [vmem:[#allocation5 + $0x158] sm:$0xf0]  ;;  %v1773_v62 = vld [vmem:[#allocation5 + $0x2d4] sm:$0xf]  ;;  %v1357_v3 = vld [vmem:[#allocation5 + $0x148] sm:$0xf0] }
  0x50   :  { %839 = vmatpush.bf16.msra.mxu2 %v1288_v49  ;;  %v1565_v49 = vld [vmem:[#allocation5 + $0x2e8] sm:$0xf0]  ;;  %v1368_v59 = vor.u32 %v1725_v51, %v1365_v52  ;;  %v1755_v5 = vld [vmem:[#allocation5 + $0x244] sm:$0xf]  ;;  %v1560_v8 = vor.u32 %v1773_v62, %v1557_v0  ;;  %v1753_v16 = vld [vmem:[#allocation5 + $0x234] sm:$0xf] }
  0x51   :  { %826 = vmatpush.bf16.msrb.mxu3 %v1216_v56  ;;  %v1440_v56 = vor.u32 %v1743_v43, %v1437_v46  ;;  %v1568_v57 = vor.u32 %v1775_v47, %v1565_v49  ;;  %v1485_v6 = vld [vmem:[#allocation5 + $0x248] sm:$0xf0]  ;;  %v1739_v9 = vld [vmem:[#allocation5 + $0x1c4] sm:$0xf]  ;;  %v1477_v17 = vld [vmem:[#allocation5 + $0x238] sm:$0xf0] }
  0x52   :  { %798 = vmatpush.bf16.msrb.mxu1 %v1532_v61  ;;  %v1429_v61 = vld [vmem:[#allocation5 + $0x1d8] sm:$0xf0]  ;;  %v1421_v10 = vld [vmem:[#allocation5 + $0x1c8] sm:$0xf0]  ;;  %v1488_v14 = vor.u32 %v1755_v5, %v1485_v6  ;;  %v1769_v22 = vld [vmem:[#allocation5 + $0x2b4] sm:$0xf]  ;;  %v1480_v24 = vor.u32 %v1753_v16, %v1477_v17 }
  0x53   :  { %785 = vmatpush.bf16.msrb.mxu0 %v1460_v7  ;;  %v1432_v7 = vor.u32 %v1741_v58, %v1429_v61  ;;  %v1549_v13 = vld [vmem:[#allocation5 + $0x2c8] sm:$0xf0]  ;;  %v1413_v21 = vld [vmem:[#allocation5 + $0x1b8] sm:$0xf0]  ;;  %v1719_v25 = vld [vmem:[#allocation5 + $0x124] sm:$0xf] }
  0x54   :  { %840 = vmatpush.bf16.msra.mxu2 %v1280_v2  ;;  %v1723_v2 = vld [vmem:[#allocation5 + $0x144] sm:$0xf]  ;;  %v1341_v26 = vld [vmem:[#allocation5 + $0x128] sm:$0xf0]  ;;  %v1333_v39 = vld [vmem:[#allocation5 + $0x118] sm:$0xf0] }
  0x55   :  { %827 = vmatpush.bf16.msrb.mxu3 %v1208_v11  ;;  %v1771_v11 = vld [vmem:[#allocation5 + $0x2c4] sm:$0xf]  ;;  %v1360_v12 = vor.u32 %v1723_v2, %v1357_v3  ;;  %v1533_v35 = vld [vmem:[#allocation5 + $0x2a8] sm:$0xf0]  ;;  %v1749_v40 = vld [vmem:[#allocation5 + $0x214] sm:$0xf] }
  0x56   :  { %799 = vmatpush.bf16.msrb.mxu1 %v1524_v15  ;;  %v1721_v15 = vld [vmem:[#allocation5 + $0x134] sm:$0xf]  ;;  %v1552_v18 = vor.u32 %v1771_v11, %v1549_v13  ;;  %v1735_v31 = vld [vmem:[#allocation5 + $0x1a4] sm:$0xf]  ;;  %v1397_v47 = vld [vmem:[#allocation5 + $0x198] sm:$0xf0] }
  0x57   :  { %786 = vmatpush.bf16.msrb.mxu0 %v1452_v23  ;;  %v1541_v23 = vld [vmem:[#allocation5 + $0x2b8] sm:$0xf0]  ;;  %v1767_v34 = vld [vmem:[#allocation5 + $0x2a4] sm:$0xf]  ;;  %v1765_v49 = vld [vmem:[#allocation5 + $0x294] sm:$0xf] }
  0x58   :  { %841 = vmatpush.bf16.msra.mxu2 %v1272_v19  ;;  %v1737_v19 = vld [vmem:[#allocation5 + $0x1b4] sm:$0xf]  ;;  %v1544_v30 = vor.u32 %v1769_v22, %v1541_v23  ;;  %v1536_v43 = vor.u32 %v1767_v34, %v1533_v35  ;;  %v1715_v52 = vld [vmem:[#allocation5 + $0x104] sm:$0xf]  ;;  %v1325_v53 = vld [vmem:[#allocation5 + $0x108] sm:$0xf0] }
  0x59   :  { %828 = vmatpush.bf16.msrb.mxu3 %v1200_v27  ;;  %v1751_v27 = vld [vmem:[#allocation5 + $0x224] sm:$0xf]  ;;  %v1416_v29 = vor.u32 %v1737_v19, %v1413_v21  ;;  %v1389_v62 = vld [vmem:[#allocation5 + $0x188] sm:$0xf0]  ;;  %v1786_v11 = vld [vmem:[#allocation8 + $0x28] sm:$0xff] }
  0x5a   :  { %800 = vmatpush.bf16.msrb.mxu1 %v1516_v33  ;;  %787 = vmatmul.bf16.vlgmr.msrb.gmra.mxu0 %v2057_v37  ;;  %v1405_v33 = vld [vmem:[#allocation5 + $0x1a8] sm:$0xf0]  ;;  %v1747_v55 = vld [vmem:[#allocation5 + $0x204] sm:$0xf]  ;;  %v1782_v13 = vld [vmem:[#allocation8 + $0x8] sm:$0xff] }
  0x5b   :  { %849 = vmatpush.bf16.msra.mxu0 %v1384_v28  ;;  %v1469_v28 = vld [vmem:[#allocation5 + $0x228] sm:$0xf0]  ;;  %v1731_v61 = vld [vmem:[#allocation5 + $0x184] sm:$0xf] }
  0x5c   :  { %842 = vmatpush.bf16.msra.mxu2 %v1264_v38  ;;  %829 = vmatmul.bf16.vlgmr.msrb.gmra.mxu3 %v2043_v60  ;;  %v1424_v60 = vor.u32 %v1739_v9, %v1421_v10  ;;  %v1472_v36 = vor.u32 %v1751_v27, %v1469_v28  ;;  %v1717_v38 = vld [vmem:[#allocation5 + $0x114] sm:$0xf]  ;;  %v1517_v2 = vld [vmem:[#allocation5 + $0x288] sm:$0xf0]  ;;  %v1779_v3 = vld [vmem:[#allocation5 + $0x304] sm:$0xf]  ;;  %v1392_v6 = vor.u32 %v1731_v61, %v1389_v62 }
  0x5d   :  { %877 = vmatpush.bf16.msra.mxu3 %v1512_v32  ;;  %801 = vmatmul.bf16.vlgmr.msrb.gmra.mxu1 %v2059_v44  ;;  %v1344_v32 = vor.u32 %v1719_v25, %v1341_v26  ;;  %v1336_v46 = vor.u32 %v1717_v38, %v1333_v39  ;;  %v1581_v5 = vld [vmem:[#allocation5 + $0x308] sm:$0xf0]  ;;  %v1787_v10 = vld [vmem:[#allocation8 + $0x30] sm:$0xff] }
  0x5e   :  { %863 = vmatpush.bf16.msra.mxu1 %v1448_v41  ;;  %v1461_v41 = vld [vmem:[#allocation5 + $0x218] sm:$0xf0]  ;;  %v1788_v9 = vld [vmem:[#allocation8 + $0x38] sm:$0xff] }
  0x5f   :  { %850 = vmatpush.bf16.msra.mxu0 %v1376_v45  ;;  %843 = vmatmul.bf16.vlgmr.msra.gmra.mxu2 %v2047_v4  ;;  %v1349_v4 = vld [vmem:[#allocation5 + $0x138] sm:$0xf0]  ;;  %v1733_v45 = vld [vmem:[#allocation5 + $0x194] sm:$0xf]  ;;  %v1464_v51 = vor.u32 %v1749_v40, %v1461_v41 }
  0x60   :  { %891 = vmatpush.bf16.msrb.mxu2 %v1576_v42  ;;  %v1352_v20 = vor.u32 %v1721_v15, %v1349_v4  ;;  %v1408_v42 = vor.u32 %v1735_v31, %v1405_v33  ;;  %v1781_v15 = vld [vmem:[#allocation8] sm:$0xff]  ;;  %v1796_v31 = vld [vmem:[#allocation8 + $0x78] sm:$0xff] }
  0x61   :  { %878 = vmatpush.bf16.msra.mxu3 %v1504_v50  ;;  %v1525_v50 = vld [vmem:[#allocation5 + $0x298] sm:$0xf0] }
  0x62   :  { %864 = vmatpush.bf16.msra.mxu1 %v1440_v56  ;;  %v1453_v56 = vld [vmem:[#allocation5 + $0x208] sm:$0xf0]  ;;  %v1528_v58 = vor.u32 %v1765_v49, %v1525_v50 }
  0x63   :  { %851 = vmatpush.bf16.msra.mxu0 %v1368_v59  ;;  %v1328_v59 = vor.u32 %v1715_v52, %v1325_v53  ;;  %v1456_v0 = vor.u32 %v1747_v55, %v1453_v56  ;;  %v1791_v52 = vld [vmem:[#allocation8 + $0x50] sm:$0xff]  ;;  %v1790_v55 = vld [vmem:[#allocation8 + $0x48] sm:$0xff] }
  0x64   :  { %892 = vmatpush.bf16.msrb.mxu2 %v1568_v57  ;;  %v1400_v57 = vor.u32 %v1733_v45, %v1397_v47  ;;  %v1793_v47 = vld [vmem:[#allocation8 + $0x60] sm:$0xff] }
  0x65   :  { %879 = vmatpush.bf16.msra.mxu3 %v1496_v1  ;;  %v1763_v1 = vld [vmem:[#allocation5 + $0x284] sm:$0xf] }
  0x66   :  { %865 = vmatpush.bf16.msra.mxu1 %v1432_v7  ;;  %v1520_v7 = vor.u32 %v1763_v1, %v1517_v2 }
  0x67   :  { %852 = vmatpush.bf16.msra.mxu0 %v1360_v12  ;;  %v1785_v12 = vld [vmem:[#allocation8 + $0x20] sm:$0xff] }
  0x68   :  { %893 = vmatpush.bf16.msrb.mxu2 %v1560_v8  ;;  %v1584_v8 = vor.u32 %v1779_v3, %v1581_v5 }
  0x69   :  { %880 = vmatpush.bf16.msra.mxu3 %v1488_v14 }
  0x6a   :  { %866 = vmatpush.bf16.msra.mxu1 %v1424_v60 }
  0x6b   :  { %853 = vmatpush.bf16.msra.mxu0 %v1352_v20 }
  0x6c   :  { %894 = vmatpush.bf16.msrb.mxu2 %v1552_v18 }
  0x6d   :  { %881 = vmatpush.bf16.msra.mxu3 %v1480_v24 }
  0x6e   :  { %867 = vmatpush.bf16.msra.mxu1 %v1416_v29 }
  0x6f   :  { %854 = vmatpush.bf16.msra.mxu0 %v1344_v32 }
  0x70   :  { %895 = vmatpush.bf16.msrb.mxu2 %v1544_v30 }
  0x71   :  { %882 = vmatpush.bf16.msra.mxu3 %v1472_v36  ;;  %v1795_v36 = vld [vmem:[#allocation8 + $0x70] sm:$0xff] }
  0x72   :  { %868 = vmatpush.bf16.msra.mxu1 %v1408_v42 }
  0x73   :  { %855 = vmatpush.bf16.msra.mxu0 %v1336_v46 }
  0x74   :  { %896 = vmatpush.bf16.msrb.mxu2 %v1536_v43  ;;  %v1794_v43 = vld [vmem:[#allocation8 + $0x68] sm:$0xff] }
  0x75   :  { %883 = vmatpush.bf16.msra.mxu3 %v1464_v51  ;;  %v1792_v51 = vld [vmem:[#allocation8 + $0x58] sm:$0xff] }
  0x76   :  { %869 = vmatpush.bf16.msra.mxu1 %v1400_v57  ;;  %v1789_v57 = vld [vmem:[#allocation8 + $0x40] sm:$0xff] }
  0x77   :  { %856 = vmatpush.bf16.msra.mxu0 %v1328_v59 }
  0x78   :  { %897 = vmatpush.bf16.msrb.mxu2 %v1528_v58 }
  0x79   :  { %884 = vmatpush.bf16.msra.mxu3 %v1456_v0 }
  0x7a   :  { %870 = vmatpush.bf16.msra.mxu1 %v1392_v6  ;;  %857 = vmatmul.bf16.vlgmr.msra.gmra.mxu0 %v2041_v54  ;;  %v1784_v54 = vld [vmem:[#allocation8 + $0x18] sm:$0xff] }
  0x7c   :  { %885 = vmatmul.bf16.vlgmr.msra.gmra.mxu3 %v2057_v37  ;;  %898 = vmatpush.bf16.msrb.mxu2 %v1520_v7  ;;  %v1783_v37 = vld [vmem:[#allocation8 + $0x10] sm:$0xff] }
  0x7d   :  { %871 = vmatmul.bf16.vlgmr.msra.gmra.mxu1 %v2045_v63  ;;  %v2071_v63 = vld [vmem:[#allocation7] sm:$0x3]  ;;  %1071 = vmatpush.bf16.msrb.mxu3 %v1796_v31 }
  0x7e   :  { %1057 = vmatpush.bf16.msrb.mxu1 %v1788_v9  ;;  %v225_v4 = vperm.slane %v2071_v63, 0  ;;  %v226_v62 = vperm.slane %v2071_v63, 1 }
  0x7f   :  { %899 = vmatmul.bf16.vlgmr.msrb.gmra.mxu2 %v2059_v44 }
  0x80   :  { %912 = vmatpush.bf16.msra.mxu2 %v1584_v8 }
  0x81   :  { %1072 = vmatpush.bf16.msrb.mxu3 %v1795_v36 }
  0x82   :  { %1058 = vmatpush.bf16.msrb.mxu1 %v1787_v10 }
  0x85   :  { %1073 = vmatpush.bf16.msrb.mxu3 %v1794_v43 }
  0x86   :  { %1059 = vmatpush.bf16.msrb.mxu1 %v1786_v11 }
  0x89   :  { %1074 = vmatpush.bf16.msrb.mxu3 %v1793_v47 }
  0x8a   :  { %1060 = vmatpush.bf16.msrb.mxu1 %v1785_v12 }
  0x8d   :  { %1075 = vmatpush.bf16.msrb.mxu3 %v1792_v51 }
  0x8e   :  { %1061 = vmatpush.bf16.msrb.mxu1 %v1784_v54 }
  0x8f   :  { %1586 = vmatmul.msk.bf16.vlgmr.msra.gmra.mxu2 %vm719_vm0, %v2053_v48 }
  0x91   :  { %1076 = vmatpush.bf16.msrb.mxu3 %v1791_v52 }
  0x92   :  { %1062 = vmatpush.bf16.msrb.mxu1 %v1783_v37 }
  0x95   :  { %1077 = vmatpush.bf16.msrb.mxu3 %v1790_v55 }
  0x96   :  { %1063 = vmatpush.bf16.msrb.mxu1 %v1782_v13 }
  0x99   :  { %1078 = vmatpush.bf16.msrb.mxu3 %v1789_v57 }
  0x9a   :  { %1064 = vmatpush.bf16.msrb.mxu1 %v1781_v15 }
  0xb7   :  { %v732_v44 = vpop.f32.mrf.mxu0 }
  0xb8   :  { %v733_v16 = vadd.f32 %v732_v44, %v225_v4 }
  0xba   :  { %v746_v48 = vpop.f32.mrf.mxu1 }
  0xbb   :  { %v747_v60 = vadd.f32 %v746_v48, %v733_v16 }
  0xbe   :  { %v760_v14 = vpop.f32.mrf.mxu2 }
  0xbf   :  { %v734_v17 = vpop.f32.mrf.mxu0  ;;  %v774_v19 = vpop.f32.mrf.mxu3  ;;  %v761_v22 = vadd.f32 %v760_v14, %v747_v60 }
  0xc0   :  { %v735_v21 = vadd.f32 %v734_v17, %v225_v4 }
  0xc1   :  { %v775_v25 = vadd.f32 %v774_v19, %v761_v22  ;;  %v1804_v19 = vld [vmem:[#allocation10 + $0x38] sm:$0xff]  ;;  %v1801_v22 = vld [vmem:[#allocation10 + $0x20] sm:$0xff] }
  0xc2   :  { %v748_v20 = vpop.f32.mrf.mxu1  ;;  %1156 = vmatpush.bf16.msrb.mxu0 %v1804_v19 }
  0xc3   :  { %v749_v23 = vadd.f32 %v748_v20, %v735_v21  ;;  %v1803_v20 = vld [vmem:[#allocation10 + $0x30] sm:$0xff]  ;;  %v1802_v21 = vld [vmem:[#allocation10 + $0x28] sm:$0xff] }
  0xc6   :  { %v762_v18 = vpop.f32.mrf.mxu2  ;;  %1157 = vmatpush.bf16.msrb.mxu0 %v1803_v20 }
  0xc7   :  { %v763_v28 = vadd.f32 %v762_v18, %v749_v23  ;;  %v776_v30 = vpop.f32.mrf.mxu3  ;;  %v1800_v23 = vld [vmem:[#allocation10 + $0x18] sm:$0xff] }
  0xc9   :  { %v777_v32 = vadd.f32 %v776_v30, %v763_v28 }
  0xca   :  { %1158 = vmatpush.bf16.msrb.mxu0 %v1802_v21 }
  0xce   :  { %v816_v26 = vpop.f32.mrf.mxu2  ;;  %1159 = vmatpush.bf16.msrb.mxu0 %v1801_v22 }
  0xd2   :  { %1160 = vmatpush.bf16.msrb.mxu0 %v1800_v23 }
  0xd6   :  { %v818_v40 = vpop.f32.mrf.mxu2 }
  0xd7   :  { %v788_v24 = vpop.f32.mrf.mxu0 }
  0xd8   :  { %v789_v29 = vadd.f32 %v788_v24, %v775_v25  ;;  %v1799_v24 = vld [vmem:[#allocation10 + $0x10] sm:$0xff]  ;;  %v1798_v25 = vld [vmem:[#allocation10 + $0x8] sm:$0xff] }
  0xd9   :  { %1161 = vmatpush.bf16.msrb.mxu0 %v1799_v24 }
  0xda   :  { %v802_v27 = vpop.f32.mrf.mxu1 }
  0xdb   :  { %v803_v33 = vadd.f32 %v802_v27, %v789_v29  ;;  %v1817_v29 = vld [vmem:[%s2091_s4] ss:$0 sm:$0xff] }
  0xdd   :  { %v817_v39 = vadd.f32 %v816_v26, %v803_v33  ;;  %1162 = vmatpush.bf16.msrb.mxu0 %v1798_v25  ;;  %v1797_v26 = vld [vmem:[#allocation10] sm:$0xff] }
  0xdf   :  { %v790_v34 = vpop.f32.mrf.mxu0  ;;  %v919_v45 = vmax.f32 %v817_v39, 0.0  ;;  %v830_v53 = vpop.f32.mrf.mxu3 }
  0xe0   :  { %v791_v35 = vadd.f32 %v790_v34, %v777_v32  ;;  %v831_v1 = vadd.f32 %v830_v53, %v226_v62 }
  0xe1   :  { %1163 = vmatpush.bf16.msrb.mxu0 %v1797_v26 }
  0xe2   :  { %v804_v38 = vpop.f32.mrf.mxu1  ;;  %v844_v50 = vpop.f32.mrf.mxu2 }
  0xe3   :  { %v805_v41 = vadd.f32 %v804_v38, %v791_v35  ;;  %v845_v6 = vadd.f32 %v844_v50, %v831_v1 }
  0xe5   :  { %v819_v42 = vadd.f32 %v818_v40, %v805_v41  ;;  %v1818_v40 = vld [vmem:[%s2093_s6] ss:$0 sm:$0xff] }
  0xe7   :  { %v921_v46 = vmax.f32 %v819_v42, 0.0  ;;  %v832_v58 = vpop.f32.mrf.mxu3 }
  0xe8   :  { %v833_v3 = vadd.f32 %v832_v58, %v226_v62 }
  0xe9   :  { %v923_v49 = vpack.c.bf16 %v921_v46, %v919_v45 }
  0xea   :  { %v846_v56 = vpop.f32.mrf.mxu2 }
  0xeb   :  { %1065 = vmatmul.bf16.vlgmr.msrb.gmra.mxu1 %v923_v49  ;;  %v847_v8 = vadd.f32 %v846_v56, %v833_v3 }
  0xf7   :  { %v858_v59 = vpop.f32.mrf.mxu0 }
  0xf8   :  { %v859_v9 = vadd.f32 %v858_v59, %v845_v6 }
  0xfa   :  { %v872_v0 = vpop.f32.mrf.mxu1 }
  0xfb   :  { %v873_v12 = vadd.f32 %v872_v0, %v859_v9 }
  0xff   :  { %v886_v2 = vpop.f32.mrf.mxu3  ;;  %v860_v7 = vpop.f32.mrf.mxu0 }
 0x100   :  { %v861_v10 = vadd.f32 %v860_v7, %v847_v8  ;;  %v887_v13 = vadd.f32 %v886_v2, %v873_v12 }
 0x102   :  { %v900_v61 = vpop.f32.mrf.mxu2  ;;  %v874_v11 = vpop.f32.mrf.mxu1 }
 0x103   :  { %v875_v44 = vadd.f32 %v874_v11, %v861_v10  ;;  %v901_v15 = vadd.f32 %v900_v61, %v887_v13 }
 0x107   :  { %v888_v54 = vpop.f32.mrf.mxu3 }
 0x108   :  { %v889_v14 = vadd.f32 %v888_v54, %v875_v44 }
 0x10a   :  { %v902_v5 = vpop.f32.mrf.mxu2 }
 0x10b   :  { %v903_v48 = vadd.f32 %v902_v5, %v889_v14 }
 0x112   :  { %v914_v37 = vpop.f32.mrf.mxu2 }
 0x113   :  { %v915_v63 = vadd.f32 %v914_v37, %v901_v15 }
 0x115   :  { %v920_v17 = vmax.f32 %v915_v63, 0.0 }
 0x11a   :  { %v916_v4 = vpop.f32.mrf.mxu2 }
 0x11b   :  { %v917_v16 = vadd.f32 %v916_v4, %v903_v48 }
 0x11d   :  { %v922_v60 = vmax.f32 %v917_v16, 0.0 }
 0x11f   :  { %v924_v18 = vpack.c.bf16 %v922_v60, %v920_v17 }
 0x121   :  { %1079 = vmatmul.bf16.vlgmr.msrb.gmra.mxu3 %v924_v18 }
 0x168   :  { %v1066_v27 = vpop.f32.mrf.mxu1 }
 0x169   :  { %v1067_v31 = vadd.f32 %v1817_v29, %v1066_v27 }
 0x170   :  { %v1068_v30 = vpop.f32.mrf.mxu1 }
 0x171   :  { %v1069_v32 = vadd.f32 %v1817_v29, %v1068_v30 }
 0x1a4   :  { %v1080_v28 = vpop.f32.mrf.mxu3 }
 0x1a5   :  { %v1081_v33 = vadd.f32 %v1080_v28, %v1067_v31 }
 0x1a7   :  { %v1085_v36 = vmax.f32 %v1081_v33, 0.0 }
 0x1ac   :  { %v1082_v34 = vpop.f32.mrf.mxu3 }
 0x1ad   :  { %v1083_v35 = vadd.f32 %v1082_v34, %v1069_v32 }
 0x1af   :  { %v1086_v38 = vmax.f32 %v1083_v35, 0.0 }
 0x1b1   :  { %v1087_v39 = vpack.c.bf16 %v1086_v38, %v1085_v36 }
 0x1b3   :  { %1164 = vmatmul.bf16.vlgmr.msrb.gmra.mxu0 %v1087_v39 }
 0x230   :  { %v1165_v41 = vpop.f32.mrf.mxu0 }
 0x231   :  { %v1166_v42 = vadd.f32 %v1818_v40, %v1165_v41 }
 0x233   :  { %1170 = vst [vmem:[#allocation11] sm:$0xff] %v1166_v42 }
 0x238   :  { %v1167_v43 = vpop.f32.mrf.mxu0 }
 0x239   :  { %v1168_v45 = vadd.f32 %v1818_v40, %v1167_v43 }
 0x23b   :  { %1171 = vst [vmem:[#allocation11 + $0x8] sm:$0xff] %v1168_v45 }
 0x23c   :  { %1184 = dma.vmem_to_hbm [thread:$0]  %s1177_s11, 256, %s1179_s1, [#allocation4], %s1972_s9, %s1972_s9, %s1973_s10  }
 0x23d   :  { %1969 = dma.done.wait [#allocation4], 256  }
 0x23e   :  { %1970 = vsyncadd [#allocation4], 4294967040 }
 0x23f   :  { %1189 = vsyncpa [#allocation3], 1 }
 0x240   :  { %1190 = vsyncpa [#allocation6], 1 }
 0x241   :  { %1191 = vsyncpa [#allocation9], 1 }
 0x242   :  { %1192 = vsyncpa [#allocation4], 1 }

</bundles_post_ra>
